<compile_context>
chip_gen: v5e
topology: v5e:2x2
jax: 0.10.0
libtpu: 0.0.40
codegen_flags: <defaults>
</compile_context>

<pallas_src>
import functools

import jax
import jax.numpy as jnp
from jax.experimental import pallas as pl
from jax.experimental.pallas import tpu as pltpu


def _dma_copy_kernel(x_hbm, o_hbm, sems, *, row_chunks):
    """Gridless HBM->HBM copy: a few concurrently-outstanding DMAs."""
    copies = []
    for i, (start, size) in enumerate(row_chunks):
        cp = pltpu.make_async_copy(
            x_hbm.at[pl.ds(start, size), :],
            o_hbm.at[pl.ds(start, size), :],
            sems.at[i],
        )
        cp.start()
        copies.append(cp)
    for cp in copies:
        cp.wait()


def _sublane_align(dtype) -> int:
    # 8 rows for 32-bit, 16 for bf16/f16, 32 for int8/fp8 (sublane packing).
    return max(8, 32 // jnp.dtype(dtype).itemsize)


def _row_chunks(rows: int, align: int, max_chunks: int = 4):
    """Split [0, rows) into <= max_chunks contiguous, align-multiple chunks."""
    aligned_groups = max(1, rows // align)
    n = min(max_chunks, aligned_groups)
    chunk = -(-rows // n)                 # ceil(rows / n)
    chunk = -(-chunk // align) * align    # round up to alignment
    chunks = []
    start = 0
    while start < rows:
        size = min(chunk, rows - start)
        chunks.append((start, size))
        start += size
    return tuple(chunks)


def height_compression(x):
    """x: (N, C, D, H, W) dense voxel features -> (N, C*D, H, W) BEV features."""
    N, C, D, H, W = x.shape
    R = C * D          # fused BEV feature channels
    HW = H * W         # flattened spatial extent (lane-dense axis)
    rows = N * R

    # Free metadata reshape in the wrapper: the whole module is a view; we
    # only flatten to a 2-D (rows, HW) lane-dense slab for the DMA copy.
    x2 = x.reshape(rows, HW)

    itemsize = jnp.dtype(x.dtype).itemsize
    chunks = _row_chunks(rows, _sublane_align(x.dtype), max_chunks=4)
    total_bytes = rows * HW * itemsize

    out2 = pl.pallas_call(
        functools.partial(_dma_copy_kernel, row_chunks=chunks),
        out_shape=jax.ShapeDtypeStruct((rows, HW), x.dtype),
        in_specs=[pl.BlockSpec(memory_space=pl.ANY)],
        out_specs=pl.BlockSpec(memory_space=pl.ANY),
        scratch_shapes=[pltpu.SemaphoreType.DMA((len(chunks),))],
        cost_estimate=pl.CostEstimate(
            flops=0, transcendentals=0, bytes_accessed=2 * total_bytes
        ),
    )(x2)

    # Free metadata reshape back to (N, C*D, H, W).
    return out2.reshape(N, R, H, W)


if __name__ == "__main__":
    key = jax.random.PRNGKey(0)
    # Small shapes consistent with a voxel backbone output:
    # batch=2, channels=4, depth (height bins)=8, spatial 16x16.
    N, C, D, H, W = 2, 4, 8, 16, 16
    NUM_BEV_FEATURES = C * D  # corresponds to model_cfg.NUM_BEV_FEATURES

    x = jax.random.normal(key, (N, C, D, H, W), dtype=jnp.float32)

    out = height_compression(x)
    out = jax.block_until_ready(out)

    # Reference: exactly what the PyTorch module computes (a view/reshape).
    ref = x.reshape(N, C * D, H, W)

    assert out.shape == (N, NUM_BEV_FEATURES, H, W), out.shape
    assert out.dtype == x.dtype
    assert jnp.allclose(out, ref), "mismatch vs reference reshape"
    print("KERNEL_OK")
</pallas_src>

<mosaic_0001>
module attributes {stable_mosaic.version = 11 : i64} {
  func.func @_dma_copy_kernel(%arg0: memref<64x256xf32, #tpu.memory_space<any>>, %arg1: memref<64x256xf32, #tpu.memory_space<any>>, %arg2: memref<4x!tpu.dma_semaphore, #tpu.memory_space<semaphore_mem>>) attributes {dimension_semantics = [], scalar_prefetch = 0 : i64, scratch_operands = 1 : i64, tpu.core_type = #tpu.core_type<tc>} {
    %c0_i32 = arith.constant 0 : i32
    %c0_i32_0 = arith.constant 0 : i32
    %c0_i32_1 = arith.constant 0 : i32
    %0 = tpu.memref_slice %arg0[%c0_i32_0, %c0_i32_1] : memref<64x256xf32, #tpu.memory_space<any>> -> memref<16x256xf32, #tpu.memory_space<any>>
    %c0_i32_2 = arith.constant 0 : i32
    %c0_i32_3 = arith.constant 0 : i32
    %1 = tpu.memref_slice %arg1[%c0_i32_2, %c0_i32_3] : memref<64x256xf32, #tpu.memory_space<any>> -> memref<16x256xf32, #tpu.memory_space<any>>
    %2 = tpu.memref_slice %arg2[%c0_i32] : memref<4x!tpu.dma_semaphore, #tpu.memory_space<semaphore_mem>> -> memref<1x!tpu.dma_semaphore, #tpu.memory_space<semaphore_mem>>
    %3 = tpu.memref_squeeze %2 : memref<1x!tpu.dma_semaphore, #tpu.memory_space<semaphore_mem>> -> memref<!tpu.dma_semaphore, #tpu.memory_space<semaphore_mem>>
    tpu.enqueue_dma source(%0 : memref<16x256xf32, #tpu.memory_space<any>>) target(%1 : memref<16x256xf32, #tpu.memory_space<any>>) target_semaphore(%3 : memref<!tpu.dma_semaphore, #tpu.memory_space<semaphore_mem>>)
    %c1_i32 = arith.constant 1 : i32
    %c16_i32 = arith.constant 16 : i32
    %c0_i32_4 = arith.constant 0 : i32
    %4 = tpu.memref_slice %arg0[%c16_i32, %c0_i32_4] : memref<64x256xf32, #tpu.memory_space<any>> -> memref<16x256xf32, #tpu.memory_space<any>>
    %c16_i32_5 = arith.constant 16 : i32
    %c0_i32_6 = arith.constant 0 : i32
    %5 = tpu.memref_slice %arg1[%c16_i32_5, %c0_i32_6] : memref<64x256xf32, #tpu.memory_space<any>> -> memref<16x256xf32, #tpu.memory_space<any>>
    %6 = tpu.memref_slice %arg2[%c1_i32] : memref<4x!tpu.dma_semaphore, #tpu.memory_space<semaphore_mem>> -> memref<1x!tpu.dma_semaphore, #tpu.memory_space<semaphore_mem>>
    %7 = tpu.memref_squeeze %6 : memref<1x!tpu.dma_semaphore, #tpu.memory_space<semaphore_mem>> -> memref<!tpu.dma_semaphore, #tpu.memory_space<semaphore_mem>>
    tpu.enqueue_dma source(%4 : memref<16x256xf32, #tpu.memory_space<any>>) target(%5 : memref<16x256xf32, #tpu.memory_space<any>>) target_semaphore(%7 : memref<!tpu.dma_semaphore, #tpu.memory_space<semaphore_mem>>)
    %c2_i32 = arith.constant 2 : i32
    %c32_i32 = arith.constant 32 : i32
    %c0_i32_7 = arith.constant 0 : i32
    %8 = tpu.memref_slice %arg0[%c32_i32, %c0_i32_7] : memref<64x256xf32, #tpu.memory_space<any>> -> memref<16x256xf32, #tpu.memory_space<any>>
    %c32_i32_8 = arith.constant 32 : i32
    %c0_i32_9 = arith.constant 0 : i32
    %9 = tpu.memref_slice %arg1[%c32_i32_8, %c0_i32_9] : memref<64x256xf32, #tpu.memory_space<any>> -> memref<16x256xf32, #tpu.memory_space<any>>
    %10 = tpu.memref_slice %arg2[%c2_i32] : memref<4x!tpu.dma_semaphore, #tpu.memory_space<semaphore_mem>> -> memref<1x!tpu.dma_semaphore, #tpu.memory_space<semaphore_mem>>
    %11 = tpu.memref_squeeze %10 : memref<1x!tpu.dma_semaphore, #tpu.memory_space<semaphore_mem>> -> memref<!tpu.dma_semaphore, #tpu.memory_space<semaphore_mem>>
    tpu.enqueue_dma source(%8 : memref<16x256xf32, #tpu.memory_space<any>>) target(%9 : memref<16x256xf32, #tpu.memory_space<any>>) target_semaphore(%11 : memref<!tpu.dma_semaphore, #tpu.memory_space<semaphore_mem>>)
    %c3_i32 = arith.constant 3 : i32
    %c48_i32 = arith.constant 48 : i32
    %c0_i32_10 = arith.constant 0 : i32
    %12 = tpu.memref_slice %arg0[%c48_i32, %c0_i32_10] : memref<64x256xf32, #tpu.memory_space<any>> -> memref<16x256xf32, #tpu.memory_space<any>>
    %c48_i32_11 = arith.constant 48 : i32
    %c0_i32_12 = arith.constant 0 : i32
    %13 = tpu.memref_slice %arg1[%c48_i32_11, %c0_i32_12] : memref<64x256xf32, #tpu.memory_space<any>> -> memref<16x256xf32, #tpu.memory_space<any>>
    %14 = tpu.memref_slice %arg2[%c3_i32] : memref<4x!tpu.dma_semaphore, #tpu.memory_space<semaphore_mem>> -> memref<1x!tpu.dma_semaphore, #tpu.memory_space<semaphore_mem>>
    %15 = tpu.memref_squeeze %14 : memref<1x!tpu.dma_semaphore, #tpu.memory_space<semaphore_mem>> -> memref<!tpu.dma_semaphore, #tpu.memory_space<semaphore_mem>>
    tpu.enqueue_dma source(%12 : memref<16x256xf32, #tpu.memory_space<any>>) target(%13 : memref<16x256xf32, #tpu.memory_space<any>>) target_semaphore(%15 : memref<!tpu.dma_semaphore, #tpu.memory_space<semaphore_mem>>)
    %c0_i32_13 = arith.constant 0 : i32
    %c0_i32_14 = arith.constant 0 : i32
    %c0_i32_15 = arith.constant 0 : i32
    %16 = tpu.memref_slice %arg0[%c0_i32_14, %c0_i32_15] : memref<64x256xf32, #tpu.memory_space<any>> -> memref<16x256xf32, #tpu.memory_space<any>>
    %c0_i32_16 = arith.constant 0 : i32
    %c0_i32_17 = arith.constant 0 : i32
    %17 = tpu.memref_slice %arg1[%c0_i32_16, %c0_i32_17] : memref<64x256xf32, #tpu.memory_space<any>> -> memref<16x256xf32, #tpu.memory_space<any>>
    %18 = tpu.memref_slice %arg2[%c0_i32_13] : memref<4x!tpu.dma_semaphore, #tpu.memory_space<semaphore_mem>> -> memref<1x!tpu.dma_semaphore, #tpu.memory_space<semaphore_mem>>
    %19 = tpu.memref_squeeze %18 : memref<1x!tpu.dma_semaphore, #tpu.memory_space<semaphore_mem>> -> memref<!tpu.dma_semaphore, #tpu.memory_space<semaphore_mem>>
    tpu.wait_dma2 semaphore(%19 : memref<!tpu.dma_semaphore, #tpu.memory_space<semaphore_mem>>) src(%16 : memref<16x256xf32, #tpu.memory_space<any>>) dst(%17 : memref<16x256xf32, #tpu.memory_space<any>>)
    %c1_i32_18 = arith.constant 1 : i32
    %c16_i32_19 = arith.constant 16 : i32
    %c0_i32_20 = arith.constant 0 : i32
    %20 = tpu.memref_slice %arg0[%c16_i32_19, %c0_i32_20] : memref<64x256xf32, #tpu.memory_space<any>> -> memref<16x256xf32, #tpu.memory_space<any>>
    %c16_i32_21 = arith.constant 16 : i32
    %c0_i32_22 = arith.constant 0 : i32
    %21 = tpu.memref_slice %arg1[%c16_i32_21, %c0_i32_22] : memref<64x256xf32, #tpu.memory_space<any>> -> memref<16x256xf32, #tpu.memory_space<any>>
    %22 = tpu.memref_slice %arg2[%c1_i32_18] : memref<4x!tpu.dma_semaphore, #tpu.memory_space<semaphore_mem>> -> memref<1x!tpu.dma_semaphore, #tpu.memory_space<semaphore_mem>>
    %23 = tpu.memref_squeeze %22 : memref<1x!tpu.dma_semaphore, #tpu.memory_space<semaphore_mem>> -> memref<!tpu.dma_semaphore, #tpu.memory_space<semaphore_mem>>
    tpu.wait_dma2 semaphore(%23 : memref<!tpu.dma_semaphore, #tpu.memory_space<semaphore_mem>>) src(%20 : memref<16x256xf32, #tpu.memory_space<any>>) dst(%21 : memref<16x256xf32, #tpu.memory_space<any>>)
    %c2_i32_23 = arith.constant 2 : i32
    %c32_i32_24 = arith.constant 32 : i32
    %c0_i32_25 = arith.constant 0 : i32
    %24 = tpu.memref_slice %arg0[%c32_i32_24, %c0_i32_25] : memref<64x256xf32, #tpu.memory_space<any>> -> memref<16x256xf32, #tpu.memory_space<any>>
    %c32_i32_26 = arith.constant 32 : i32
    %c0_i32_27 = arith.constant 0 : i32
    %25 = tpu.memref_slice %arg1[%c32_i32_26, %c0_i32_27] : memref<64x256xf32, #tpu.memory_space<any>> -> memref<16x256xf32, #tpu.memory_space<any>>
    %26 = tpu.memref_slice %arg2[%c2_i32_23] : memref<4x!tpu.dma_semaphore, #tpu.memory_space<semaphore_mem>> -> memref<1x!tpu.dma_semaphore, #tpu.memory_space<semaphore_mem>>
    %27 = tpu.memref_squeeze %26 : memref<1x!tpu.dma_semaphore, #tpu.memory_space<semaphore_mem>> -> memref<!tpu.dma_semaphore, #tpu.memory_space<semaphore_mem>>
    tpu.wait_dma2 semaphore(%27 : memref<!tpu.dma_semaphore, #tpu.memory_space<semaphore_mem>>) src(%24 : memref<16x256xf32, #tpu.memory_space<any>>) dst(%25 : memref<16x256xf32, #tpu.memory_space<any>>)
    %c3_i32_28 = arith.constant 3 : i32
    %c48_i32_29 = arith.constant 48 : i32
    %c0_i32_30 = arith.constant 0 : i32
    %28 = tpu.memref_slice %arg0[%c48_i32_29, %c0_i32_30] : memref<64x256xf32, #tpu.memory_space<any>> -> memref<16x256xf32, #tpu.memory_space<any>>
    %c48_i32_31 = arith.constant 48 : i32
    %c0_i32_32 = arith.constant 0 : i32
    %29 = tpu.memref_slice %arg1[%c48_i32_31, %c0_i32_32] : memref<64x256xf32, #tpu.memory_space<any>> -> memref<16x256xf32, #tpu.memory_space<any>>
    %30 = tpu.memref_slice %arg2[%c3_i32_28] : memref<4x!tpu.dma_semaphore, #tpu.memory_space<semaphore_mem>> -> memref<1x!tpu.dma_semaphore, #tpu.memory_space<semaphore_mem>>
    %31 = tpu.memref_squeeze %30 : memref<1x!tpu.dma_semaphore, #tpu.memory_space<semaphore_mem>> -> memref<!tpu.dma_semaphore, #tpu.memory_space<semaphore_mem>>
    tpu.wait_dma2 semaphore(%31 : memref<!tpu.dma_semaphore, #tpu.memory_space<semaphore_mem>>) src(%28 : memref<16x256xf32, #tpu.memory_space<any>>) dst(%29 : memref<16x256xf32, #tpu.memory_space<any>>)
    return
  }
}

</mosaic_0001>

<bundles_post_ra>
// kernel: tpu_custom_call.1
= control target key start
LH: loop header
LB: loop body
LE: loop exit
PB: predicated region body
PF: predicated region fallthrough
CT: control target
= control target key end

     0   :  { %s117_s15 = smov [#allocation2]   ;;  %s118_s16 = smov [#allocation3]   ;;  %s164_s0 = inlined_call_operand.hbm [shape: f32[64,256], index: 0, kind: input, shape index: {}]   ;;  %s165_s1 = inlined_call_operand.hbm [shape: f32[64,256], index: 1, kind: output, shape index: {}]  }
   0x1   :  { %s10_s8 = sshll.u32 %s164_s0, 4  ;;  %s12_s11 = sshll.u32 %s165_s1, 4  ;;  %s11_s8 = int_to_ptr.hbm [resolvable:$true] %s10_s8  ;;  %s13_s11 = int_to_ptr.hbm [resolvable:$true] %s12_s11 }
   0x2   :  { %s17_s14 = scalar_lea.hbm %s164_s0, 32  ;;  %s119_s17 = smov 0  }
   0x3   :  { %16 = dma.general %s11_s8, 512, %s13_s11, %s117_s15, %s118_s16, [#allocation4], %s119_s17, 0  }
   0x4   :  { %s18_s20 = scalar_lea.hbm %s165_s1, 32  ;;  %s24_s21 = sshll.u32 %s17_s14, 4  ;;  %s25_s21 = int_to_ptr.hbm [resolvable:$true] %s24_s21 }
   0x5   :  { %s26_s22 = sshll.u32 %s18_s20, 4  ;;  %s31_s25 = scalar_lea.hbm %s164_s0, 64  ;;  %s27_s22 = int_to_ptr.hbm [resolvable:$true] %s26_s22 }
   0x6   :  { %s120_s26 = smov [#allocation2 + $0x1]   ;;  %s121_s27 = smov [#allocation5]  }
   0x7   :  { %30 = dma.general %s25_s21, 512, %s27_s22, %s120_s26, %s121_s27, [#allocation6], %s119_s17, 0  }
   0x8   :  { %s32_s30 = scalar_lea.hbm %s165_s1, 64  ;;  %s38_s2 = sshll.u32 %s31_s25, 4  ;;  %s39_s2 = int_to_ptr.hbm [resolvable:$true] %s38_s2 }
   0x9   :  { %s40_s3 = sshll.u32 %s32_s30, 4  ;;  %s45_s6 = scalar_lea.hbm %s164_s0, 96  ;;  %s41_s3 = int_to_ptr.hbm [resolvable:$true] %s40_s3 }
   0xa   :  { %s122_s7 = smov [#allocation2 + $0x2]   ;;  %s123_s8 = smov [#allocation7]  }
   0xb   :  { %44 = dma.general %s39_s2, 512, %s41_s3, %s122_s7, %s123_s8, [#allocation8], %s119_s17, 0  }
   0xc   :  { %s46_s11 = scalar_lea.hbm %s165_s1, 96  ;;  %s52_s12 = sshll.u32 %s45_s6, 4  ;;  %s53_s12 = int_to_ptr.hbm [resolvable:$true] %s52_s12 }
   0xd   :  { %s54_s13 = sshll.u32 %s46_s11, 4  ;;  %s124_s14 = smov [#allocation2 + $0x3]   ;;  %s55_s13 = int_to_ptr.hbm [resolvable:$true] %s54_s13 }
   0xe   :  { %s125_s15 = smov [#allocation9]  }
   0xf   :  { %58 = dma.general %s53_s12, 512, %s55_s13, %s124_s14, %s125_s15, [#allocation10], %s119_s17, 0  }
  0x10   :  { %109 = dma.done.wait [#allocation2], 512 }
  0x11   :  { %110 = vsyncadd [#allocation2], 4294966784 }
  0x12   :  { %111 = dma.done.wait [#allocation2 + $0x1], 512 }
  0x13   :  { %112 = vsyncadd [#allocation2 + $0x1], 4294966784 }
  0x14   :  { %113 = dma.done.wait [#allocation2 + $0x2], 512 }
  0x15   :  { %114 = vsyncadd [#allocation2 + $0x2], 4294966784 }
  0x16   :  { %115 = dma.done.wait [#allocation2 + $0x3], 512 }
  0x17   :  { %116 = vsyncadd [#allocation2 + $0x3], 4294966784 }
  0x18   :  { %69 = vsyncmov [#allocation2] }
  0x1b   :  { %s70_s0 = vpop.sfrf %69 }
  0x1c   :  { %p96_p0 = scmp.ne.s32.totalorder %s70_s0, 0 }
  0x1e   :  { %74 = shalt.err (%p96_p0)  }
  0x1f   :  { %76 = vsyncmov [#allocation2 + $0x1] }
  0x22   :  { %s77_s1 = vpop.sfrf %76 }
  0x23   :  { %p97_p1 = scmp.ne.s32.totalorder %s77_s1, 0 }
  0x25   :  { %81 = shalt.err (%p97_p1)  }
  0x26   :  { %83 = vsyncmov [#allocation2 + $0x2] }
  0x29   :  { %s84_s16 = vpop.sfrf %83 }
  0x2a   :  { %p98_p2 = scmp.ne.s32.totalorder %s84_s16, 0 }
  0x2c   :  { %88 = shalt.err (%p98_p2)  }
  0x2d   :  { %90 = vsyncmov [#allocation2 + $0x3] }
  0x30   :  { %s91_s17 = vpop.sfrf %90 }
  0x31   :  { %p99_p3 = scmp.ne.s32.totalorder %s91_s17, 0 }
  0x33   :  { %95 = shalt.err (%p99_p3)  }

</bundles_post_ra>
